<compile_context>
chip_gen: v7x
topology: tpu7x:2x2x1
jax: 0.10.0
libtpu: 0.0.40
codegen_flags: <defaults>
</compile_context>

<pallas_src>
import jax
import jax.numpy as jnp
from jax.experimental import pallas as pl
from jax.experimental.pallas import tpu as pltpu

LANE = 128


def _round_up(x, m):
    return (x + m - 1) // m * m


def qnetwork_kernel(x_ref, w1_ref, b1_ref, w2_ref, b2_ref, w3_ref, b3_ref, o_ref):
    # Layer 1: Linear(input_dim -> hidden), NO activation (matches nn.Sequential).
    # bf16 operands feed the MXU; accumulation + all VPU work (bias add, ReLU) stay f32.
    h1 = jnp.dot(x_ref[...], w1_ref[...], preferred_element_type=jnp.float32) + b1_ref[...]
    # Layer 2: Linear(hidden -> hidden) + ReLU.
    h2 = jnp.dot(h1.astype(jnp.bfloat16), w2_ref[...],
                 preferred_element_type=jnp.float32) + b2_ref[...]
    h2 = jnp.maximum(h2, 0.0)
    # Layer 3: Linear(hidden -> output_padded), lane-dense (128-wide) store.
    out = jnp.dot(h2.astype(jnp.bfloat16), w3_ref[...],
                  preferred_element_type=jnp.float32) + b3_ref[...]
    o_ref[...] = out.astype(o_ref.dtype)


def qnetwork_forward(x, params, out_dim, *, tm=128):
    """Fused QNetwork forward. x: [batch, input_dim]; returns [batch, out_dim] float32.

    params are the kernel-prepared params from prepare_params() (bf16 weights [in, out],
    f32 biases [1, out], output features padded to a multiple of 128)."""
    batch, in_dim = x.shape
    hid = params["w1"].shape[1]
    out_pad = params["w3"].shape[1]

    # Batch tile: cap at tm (<=128 keeps h1/h2 vreg pressure in check), multiple of 8
    # sublanes, and pad the batch so the grid divides evenly.
    tm_eff = min(tm, _round_up(batch, 8))
    padded_batch = _round_up(batch, tm_eff)
    x = x.astype(jnp.bfloat16)          # halve activation HBM bytes; MXU is bf16-native
    if padded_batch != batch:
        x = jnp.pad(x, ((0, padded_batch - batch), (0, 0)))

    grid = (padded_batch // tm_eff,)
    const = lambda i: (0, 0)            # weights/biases: same block every step -> resident

    flops = 2 * padded_batch * (in_dim * hid + hid * hid + hid * out_pad)
    bytes_accessed = (
        x.size * x.dtype.itemsize
        + sum(v.size * v.dtype.itemsize for v in params.values())
        + padded_batch * out_pad * 4
    )

    out = pl.pallas_call(
        qnetwork_kernel,
        out_shape=jax.ShapeDtypeStruct((padded_batch, out_pad), jnp.float32),
        grid=grid,
        in_specs=[
            pl.BlockSpec((tm_eff, in_dim), lambda i: (i, 0)),  # x: one batch tile / step
            pl.BlockSpec((in_dim, hid), const),                # w1 (resident)
            pl.BlockSpec((1, hid), const),                     # b1
            pl.BlockSpec((hid, hid), const),                   # w2
            pl.BlockSpec((1, hid), const),                     # b2
            pl.BlockSpec((hid, out_pad), const),               # w3 (padded cols)
            pl.BlockSpec((1, out_pad), const),                 # b3 (padded cols)
        ],
        out_specs=pl.BlockSpec((tm_eff, out_pad), lambda i: (i, 0)),
        compiler_params=pltpu.CompilerParams(
            dimension_semantics=("parallel",),   # shard batch tiles across TCs on v7x
        ),
        cost_estimate=pl.CostEstimate(
            flops=flops, transcendentals=0, bytes_accessed=bytes_accessed),
    )(x, params["w1"], params["b1"], params["w2"], params["b2"],
      params["w3"], params["b3"])

    return out[:batch, :out_dim]


def init_params(key, input_dim=64, hidden_dim=256, output_dim=64):
    """Deterministic init mimicking PyTorch Linear default (uniform +/- 1/sqrt(fan_in)).
    Weights are stored as [in_features, out_features] (transposed vs PyTorch)."""
    keys = jax.random.split(key, 6)

    def linear(kw, kb, fan_in, fan_out):
        bound = 1.0 / jnp.sqrt(fan_in)
        w = jax.random.uniform(kw, (fan_in, fan_out), jnp.float32, -bound, bound)
        b = jax.random.uniform(kb, (1, fan_out), jnp.float32, -bound, bound)
        return w, b

    w1, b1 = linear(keys[0], keys[1], input_dim, hidden_dim)
    w2, b2 = linear(keys[2], keys[3], hidden_dim, hidden_dim)
    w3, b3 = linear(keys[4], keys[5], hidden_dim, output_dim)
    return {"w1": w1, "b1": b1, "w2": w2, "b2": b2, "w3": w3, "b3": b3}


def prepare_params(p):
    """One-time kernel prep: bf16 weights (f32 MXU accumulation preserves accuracy),
    f32 biases (VPU math stays f32 — also the fast path on v5e), and zero-pad the output
    features to a multiple of 128 so the final store is lane-dense."""
    out_dim = p["w3"].shape[1]
    pad = _round_up(out_dim, LANE) - out_dim
    w3 = jnp.pad(p["w3"], ((0, 0), (0, pad)))
    b3 = jnp.pad(p["b3"], ((0, 0), (0, pad)))
    return {
        "w1": p["w1"].astype(jnp.bfloat16),
        "b1": p["b1"].astype(jnp.float32),
        "w2": p["w2"].astype(jnp.bfloat16),
        "b2": p["b2"].astype(jnp.float32),
        "w3": w3.astype(jnp.bfloat16),
        "b3": b3.astype(jnp.float32),
    }


def reference_forward_bf16(x, kp, out_dim):
    """Pure-JAX reference using the exact bf16-operand / f32-accumulate math of the kernel."""
    h1 = jnp.dot(x.astype(jnp.bfloat16), kp["w1"],
                 preferred_element_type=jnp.float32) + kp["b1"]
    h2 = jnp.dot(h1.astype(jnp.bfloat16), kp["w2"],
                 preferred_element_type=jnp.float32) + kp["b2"]
    h2 = jnp.maximum(h2, 0.0)
    out = jnp.dot(h2.astype(jnp.bfloat16), kp["w3"],
                  preferred_element_type=jnp.float32) + kp["b3"]
    return out[:, :out_dim]


def reference_forward_f32(x, p):
    """Full-f32 reference matching the PyTorch Sequential semantics exactly."""
    h1 = x @ p["w1"] + p["b1"]
    h2 = jnp.maximum(h1 @ p["w2"] + p["b2"], 0.0)
    return h2 @ p["w3"] + p["b3"]


if __name__ == "__main__":
    key = jax.random.PRNGKey(0)
    k_params, k_x = jax.random.split(key)

    input_dim, hidden_dim, output_dim = 64, 256, 64
    batch = 8

    raw_params = init_params(k_params, input_dim, hidden_dim, output_dim)
    kparams = prepare_params(raw_params)
    x = jax.random.normal(k_x, (batch, input_dim), dtype=jnp.float32)

    out = qnetwork_forward(x, kparams, output_dim)
    out = jax.block_until_ready(out)
    assert out.shape == (batch, output_dim), out.shape

    # Tight check vs a reference using identical bf16/f32 math.
    ref_bf16 = reference_forward_bf16(x, kparams, output_dim)
    assert jnp.allclose(out, ref_bf16, atol=2e-3, rtol=2e-3), "mismatch vs bf16 reference"

    # Looser check vs the full-f32 PyTorch-semantics reference (bf16 weight rounding only).
    ref_f32 = reference_forward_f32(x, raw_params)
    assert jnp.allclose(out, ref_f32, atol=5e-2, rtol=5e-2), "mismatch vs f32 reference"

    print("KERNEL_OK")
</pallas_src>

<mosaic_0001>
module attributes {stable_mosaic.version = 11 : i64} {
  func.func @qnetwork_kernel(%arg0: i32, %arg1: memref<8x64xbf16, #tpu.memory_space<vmem>>, %arg2: memref<64x256xbf16, #tpu.memory_space<vmem>>, %arg3: memref<1x256xf32, #tpu.memory_space<vmem>>, %arg4: memref<256x256xbf16, #tpu.memory_space<vmem>>, %arg5: memref<1x256xf32, #tpu.memory_space<vmem>>, %arg6: memref<256x128xbf16, #tpu.memory_space<vmem>>, %arg7: memref<1x128xf32, #tpu.memory_space<vmem>>, %arg8: memref<8x128xf32, #tpu.memory_space<vmem>>) attributes {dimension_semantics = [#tpu.dimension_semantics<parallel>], iteration_bounds = array<i64: 1>, scalar_prefetch = 0 : i64, scratch_operands = 0 : i64, tpu.core_type = #tpu.core_type<tc>, window_params = [{transform_indices = @transform_0, window_bounds = array<i64: 8, 64>}, {pipeline_mode = #tpu.pipeline_mode<synchronous>, transform_indices = @transform_1, window_bounds = array<i64: 64, 256>}, {pipeline_mode = #tpu.pipeline_mode<synchronous>, transform_indices = @transform_2, window_bounds = array<i64: 1, 256>}, {pipeline_mode = #tpu.pipeline_mode<synchronous>, transform_indices = @transform_3, window_bounds = array<i64: 256, 256>}, {pipeline_mode = #tpu.pipeline_mode<synchronous>, transform_indices = @transform_4, window_bounds = array<i64: 1, 256>}, {pipeline_mode = #tpu.pipeline_mode<synchronous>, transform_indices = @transform_5, window_bounds = array<i64: 256, 128>}, {pipeline_mode = #tpu.pipeline_mode<synchronous>, transform_indices = @transform_6, window_bounds = array<i64: 1, 128>}, {transform_indices = @transform_7, window_bounds = array<i64: 8, 128>}]} {
    %c0 = arith.constant 0 : index
    %c0_0 = arith.constant 0 : index
    %0 = vector.load %arg1[%c0, %c0_0] : memref<8x64xbf16, #tpu.memory_space<vmem>>, vector<8x64xbf16>
    %c0_1 = arith.constant 0 : index
    %c0_2 = arith.constant 0 : index
    %1 = vector.load %arg2[%c0_1, %c0_2] : memref<64x256xbf16, #tpu.memory_space<vmem>>, vector<64x256xbf16>
    %cst = arith.constant dense<0.000000e+00> : vector<8x256xf32>
    %2 = tpu.matmul %0, %1, %cst {dimension_numbers = #tpu.dot_dimension_numbers<[1], [0], [0], [1], [0, 0, 1, 1], [], []>} : vector<8x64xbf16>, vector<64x256xbf16>, vector<8x256xf32> -> vector<8x256xf32>
    %c0_3 = arith.constant 0 : index
    %c0_4 = arith.constant 0 : index
    %3 = vector.load %arg3[%c0_3, %c0_4] : memref<1x256xf32, #tpu.memory_space<vmem>>, vector<1x256xf32>
    %4 = vector.broadcast %3 : vector<1x256xf32> to vector<8x256xf32>
    %5 = arith.addf %2, %4 : vector<8x256xf32>
    %6 = arith.truncf %5 : vector<8x256xf32> to vector<8x256xbf16>
    %c0_5 = arith.constant 0 : index
    %c0_6 = arith.constant 0 : index
    %7 = vector.load %arg4[%c0_5, %c0_6] : memref<256x256xbf16, #tpu.memory_space<vmem>>, vector<256x256xbf16>
    %cst_7 = arith.constant dense<0.000000e+00> : vector<8x256xf32>
    %8 = tpu.matmul %6, %7, %cst_7 {dimension_numbers = #tpu.dot_dimension_numbers<[1], [0], [0], [1], [0, 0, 1, 1], [], []>} : vector<8x256xbf16>, vector<256x256xbf16>, vector<8x256xf32> -> vector<8x256xf32>
    %c0_8 = arith.constant 0 : index
    %c0_9 = arith.constant 0 : index
    %9 = vector.load %arg5[%c0_8, %c0_9] : memref<1x256xf32, #tpu.memory_space<vmem>>, vector<1x256xf32>
    %10 = vector.broadcast %9 : vector<1x256xf32> to vector<8x256xf32>
    %11 = arith.addf %8, %10 : vector<8x256xf32>
    %cst_10 = arith.constant 0.000000e+00 : f32
    %12 = vector.broadcast %cst_10 : f32 to vector<8x256xf32>
    %13 = arith.maximumf %11, %12 : vector<8x256xf32>
    %14 = arith.truncf %13 : vector<8x256xf32> to vector<8x256xbf16>
    %c0_11 = arith.constant 0 : index
    %c0_12 = arith.constant 0 : index
    %15 = vector.load %arg6[%c0_11, %c0_12] : memref<256x128xbf16, #tpu.memory_space<vmem>>, vector<256x128xbf16>
    %cst_13 = arith.constant dense<0.000000e+00> : vector<8x128xf32>
    %16 = tpu.matmul %14, %15, %cst_13 {dimension_numbers = #tpu.dot_dimension_numbers<[1], [0], [0], [1], [0, 0, 1, 1], [], []>} : vector<8x256xbf16>, vector<256x128xbf16>, vector<8x128xf32> -> vector<8x128xf32>
    %c0_14 = arith.constant 0 : index
    %c0_15 = arith.constant 0 : index
    %17 = vector.load %arg7[%c0_14, %c0_15] : memref<1x128xf32, #tpu.memory_space<vmem>>, vector<1x128xf32>
    %18 = vector.broadcast %17 : vector<1x128xf32> to vector<8x128xf32>
    %19 = arith.addf %16, %18 : vector<8x128xf32>
    %c0_16 = arith.constant 0 : index
    %c0_17 = arith.constant 0 : index
    %20 = vector.load %arg8[%c0_16, %c0_17] : memref<8x128xf32, #tpu.memory_space<vmem>>, vector<8x128xf32>
    tpu.vector_store %arg8[%c0_16, %c0_17], %19 {strides = array<i32>} : memref<8x128xf32, #tpu.memory_space<vmem>>, vector<8x128xf32>,
    return
  }
  func.func @transform_0(%arg0: i32) -> (i32, i32) {
    %c0_i32 = arith.constant 0 : i32
    %c0_i32_0 = arith.constant 0 : i32
    return %arg0, %c0_i32 : i32, i32
  }
  func.func @transform_1(%arg0: i32) -> (i32, i32) {
    %c0_i32 = arith.constant 0 : i32
    %c0_i32_0 = arith.constant 0 : i32
    %c0_i32_1 = arith.constant 0 : i32
    return %c0_i32, %c0_i32_0 : i32, i32
  }
  func.func @transform_2(%arg0: i32) -> (i32, i32) {
    %c0_i32 = arith.constant 0 : i32
    %c0_i32_0 = arith.constant 0 : i32
    %c0_i32_1 = arith.constant 0 : i32
    return %c0_i32, %c0_i32_0 : i32, i32
  }
  func.func @transform_3(%arg0: i32) -> (i32, i32) {
    %c0_i32 = arith.constant 0 : i32
    %c0_i32_0 = arith.constant 0 : i32
    %c0_i32_1 = arith.constant 0 : i32
    return %c0_i32, %c0_i32_0 : i32, i32
  }
  func.func @transform_4(%arg0: i32) -> (i32, i32) {
    %c0_i32 = arith.constant 0 : i32
    %c0_i32_0 = arith.constant 0 : i32
    %c0_i32_1 = arith.constant 0 : i32
    return %c0_i32, %c0_i32_0 : i32, i32
  }
  func.func @transform_5(%arg0: i32) -> (i32, i32) {
    %c0_i32 = arith.constant 0 : i32
    %c0_i32_0 = arith.constant 0 : i32
    %c0_i32_1 = arith.constant 0 : i32
    return %c0_i32, %c0_i32_0 : i32, i32
  }
  func.func @transform_6(%arg0: i32) -> (i32, i32) {
    %c0_i32 = arith.constant 0 : i32
    %c0_i32_0 = arith.constant 0 : i32
    %c0_i32_1 = arith.constant 0 : i32
    return %c0_i32, %c0_i32_0 : i32, i32
  }
  func.func @transform_7(%arg0: i32) -> (i32, i32) {
    %c0_i32 = arith.constant 0 : i32
    %c0_i32_0 = arith.constant 0 : i32
    return %arg0, %c0_i32 : i32, i32
  }
}

</mosaic_0001>

<bundles_post_ra>
// kernel: tpu_custom_call.1
= control target key start
LH: loop header
LB: loop body
LE: loop exit
PB: predicated region body
PF: predicated region fallthrough
CT: control target
= control target key end

     0   :  { %12 = vsyncpa [#allocation3], 0  ;;  %s1040_s0 = inlined_call_operand.hbm [shape: bf16[8,64], index: 0, kind: input, shape index: {}]   ;;  %s1041_s1 = inlined_call_operand.hbm [shape: bf16[64,256], index: 1, kind: input, shape index: {}]   ;;  %s1042_s2 = inlined_call_operand.vmem [shape: f32[1,256], index: 2, kind: input, shape index: {}]   ;;  %s1043_s3 = inlined_call_operand.hbm [shape: bf16[256,256], index: 3, kind: input, shape index: {}]   ;;  %s1044_s4 = inlined_call_operand.vmem [shape: f32[1,256], index: 4, kind: input, shape index: {}]   ;;  %s1045_s5 = inlined_call_operand.hbm [shape: bf16[256,128], index: 5, kind: input, shape index: {}]   ;;  %s1046_s6 = inlined_call_operand.vmem [shape: f32[1,128], index: 6, kind: input, shape index: {}]   ;;  %s1047_s7 = inlined_call_operand.hbm [shape: f32[8,128], index: 7, kind: output, shape index: {}]  }
   0x1   :  { %13 = vsyncpa [#allocation6], 0 }
   0x2   :  { %14 = vsyncpa [#allocation9], 0 }
   0x3   :  { %15 = vsyncpa [#allocation4], 0  ;;  %s915_s24 = smov [#allocation5]   ;;  %s797_s28 = scalar_lea.hbm %s1041_s1, 1024 }
   0x4   :  { %s31_s25 = sshll.u32 %s915_s24, 4  ;;  %p798_p0 = scmp.ne.s32.totalorder %s1041_s1, %s797_s28  ;;  %s32_s25 = int_to_ptr.vmem [resolvable:$true] %s31_s25 }
   0x5   :  { %p801_p1 = scmp.lt.u32.totalorder %s797_s28, %s1041_s1 }
   0x7   :  { %p803_p2 = pnand %p801_p1, %p798_p0 }
   0x9   :  { %806 = shalt.err (!%p803_p2)
}
   0xa   :  { %s807_s10 = scalar_lea.vmem %s32_s25, 1024  ;;  %p812_p4 = scmp.lt.s32.totalorder %s32_s25, %s32_s25 }
   0xb   :  { %p808_p3 = scmp.ne.s32.totalorder %s32_s25, %s807_s10  ;;  %p813_p5 = scmp.lt.s32.totalorder %s807_s10, %s807_s10 }
   0xd   :  { %p814_p6 = por %p813_p5, %p812_p4 }
   0xf   :  { %p815_p7 = pnand %p814_p6, %p808_p3 }
  0x11   :  { %818 = shalt.err (!%p815_p7)
}
  0x12   :  { %s916_s11 = smov 128   ;;  %s917_s12 = smov 8  }
  0x13   :  { %37 = dma.hbm_to_vmem [thread:$0]  %s1041_s1, 1024, %s32_s25, [#allocation6], %s916_s11, %s916_s11, %s917_s12  }
  0x14   :  { %s918_s15 = smov [#allocation2]   ;;  %s919_s17 = smov [#allocation7]  }
  0x15   :  { %s22_s16 = sshll.u32 %s918_s15, 4  ;;  %s45_s18 = sshll.u32 %s919_s17, 4  ;;  %s23_s16 = int_to_ptr.vmem [resolvable:$true] %s22_s16  ;;  %s46_s18 = int_to_ptr.vmem [resolvable:$true] %s45_s18 }
  0x16   :  { %s819_s21 = scalar_lea.hbm %s1040_s0, 64 }
  0x17   :  { %p820_p8 = scmp.ne.s32.totalorder %s1040_s0, %s819_s21  ;;  %p823_p9 = scmp.lt.u32.totalorder %s819_s21, %s1040_s0 }
  0x19   :  { %p825_p10 = pnand %p823_p9, %p820_p8 }
  0x1b   :  { %828 = shalt.err (!%p825_p10)
}
  0x1c   :  { %s829_s1 = scalar_lea.vmem %s23_s16, 64  ;;  %p834_p12 = scmp.lt.s32.totalorder %s23_s16, %s23_s16 }
  0x1d   :  { %p830_p11 = scmp.ne.s32.totalorder %s23_s16, %s829_s1  ;;  %p835_p13 = scmp.lt.s32.totalorder %s829_s1, %s829_s1 }
  0x1f   :  { %p836_p0 = por %p835_p13, %p834_p12 }
  0x21   :  { %p837_p1 = pnand %p836_p0, %p830_p11 }
  0x23   :  { %840 = shalt.err (!%p837_p1)
}
  0x24   :  { %25 = dma.hbm_to_vmem [thread:$0]  %s1040_s0, 64, %s23_s16, [#allocation3]  }
  0x25   :  { %s841_s30 = scalar_lea.hbm %s1043_s3, 4096 }
  0x26   :  { %p842_p2 = scmp.ne.s32.totalorder %s1043_s3, %s841_s30  ;;  %p845_p3 = scmp.lt.u32.totalorder %s841_s30, %s1043_s3 }
  0x28   :  { %p847_p4 = pnand %p845_p3, %p842_p2 }
  0x2a   :  { %850 = shalt.err (!%p847_p4)
}
  0x2b   :  { %s851_s14 = scalar_lea.vmem %s46_s18, 4096  ;;  %p856_p6 = scmp.lt.s32.totalorder %s46_s18, %s46_s18 }
  0x2c   :  { %p852_p5 = scmp.ne.s32.totalorder %s46_s18, %s851_s14  ;;  %p857_p7 = scmp.lt.s32.totalorder %s851_s14, %s851_s14 }
  0x2e   :  { %p858_p8 = por %p857_p7, %p856_p6 }
  0x30   :  { %p859_p9 = pnand %p858_p8, %p852_p5 }
  0x32   :  { %862 = shalt.err (!%p859_p9)
}
  0x33   :  { %51 = dma.hbm_to_vmem [thread:$0]  %s1043_s3, 4096, %s46_s18, [#allocation6], %s916_s11, %s916_s11, %s917_s12  }
  0x34   :  { %s920_s16 = smov [#allocation8]   ;;  %s863_s21 = scalar_lea.hbm %s1045_s5, 2048 }
  0x35   :  { %s59_s17 = sshll.u32 %s920_s16, 4  ;;  %p864_p10 = scmp.ne.s32.totalorder %s1045_s5, %s863_s21  ;;  %s60_s17 = int_to_ptr.vmem [resolvable:$true] %s59_s17 }
  0x36   :  { %p867_p11 = scmp.lt.u32.totalorder %s863_s21, %s1045_s5 }
  0x38   :  { %p869_p12 = pnand %p867_p11, %p864_p10 }
  0x3a   :  { %872 = shalt.err (!%p869_p12)
}
  0x3b   :  { %s873_s1 = scalar_lea.vmem %s60_s17, 2048  ;;  %p878_p0 = scmp.lt.s32.totalorder %s60_s17, %s60_s17 }
  0x3c   :  { %p874_p13 = scmp.ne.s32.totalorder %s60_s17, %s873_s1  ;;  %p879_p1 = scmp.lt.s32.totalorder %s873_s1, %s873_s1 }
  0x3e   :  { %p880_p2 = por %p879_p1, %p878_p0 }
  0x40   :  { %p881_p3 = pnand %p880_p2, %p874_p13 }
  0x42   :  { %884 = shalt.err (!%p881_p3)
}
  0x43   :  { %s921_s3 = smov 64   ;;  %s922_s11 = smov 4  }
  0x44   :  { %65 = dma.hbm_to_vmem [thread:$0]  %s1045_s5, 2048, %s60_s17, [#allocation9], %s921_s3, %s921_s3, %s922_s11  }
  0x45   :  { %907 = dma.done.wait [#allocation3], 64  }
  0x46   :  { %908 = vsyncadd [#allocation3], 4294967232 }
  0x47   :  { %909 = dma.done.wait [#allocation6], 5120  }
  0x48   :  { %910 = vsyncadd [#allocation6], 4294962176 }
  0x49   :  { %911 = dma.done.wait [#allocation9], 2048  }
  0x4a   :  { %912 = vsyncadd [#allocation9], 4294965248  ;;  %v923_v0 = vmov 0   ;;  %v721_v1 = vld [vmem:[#allocation5 + $0x4] ss:$8 sps:$4 sm:$0xff]   ;;  %vm142_vm0 = vcmask 523264   ;;  %v92_v54 = vlaneseq }
  0x4b   :  { %178 = vmatprep.mubr.bf16.mxu0 %v923_v0  ;;  %v723_v2 = vld [vmem:[#allocation5] ss:$8 sps:$4 sm:$0xff]   ;;  %146 = vmatprep.subr.bf16.mxu0 %v721_v1  ;;  %v724_v3 = vld [vmem:[#allocation5 + $0x14] ss:$8 sps:$4 sm:$0xff]   ;;  %v726_v4 = vld [vmem:[#allocation5 + $0x10] ss:$8 sps:$4 sm:$0xff]  }
  0x4c   :  { %147 = vmatpush1.bf16.msra.mxu0 %v723_v2  ;;  %v727_v5 = vld [vmem:[#allocation5 + $0x24] ss:$8 sps:$4 sm:$0xff]   ;;  %v729_v6 = vld [vmem:[#allocation5 + $0x20] ss:$8 sps:$4 sm:$0xff]   ;;  %v736_v9 = vld [vmem:[#allocation7 + $0x14] ss:$8 sps:$4 sm:$0xff]  }
  0x4d   :  { %148 = vmatprep.subr.bf16.mxu0 %v724_v3  ;;  %v733_v7 = vld [vmem:[#allocation7 + $0x4] ss:$8 sps:$4 sm:$0xff]   ;;  %v735_v8 = vld [vmem:[#allocation7] ss:$8 sps:$4 sm:$0xff]   ;;  %v730_v10 = vld [vmem:[#allocation5 + $0x34] ss:$8 sps:$4 sm:$0xff]  }
  0x4e   :  { %393 = vmatprep.subr.bf16.mxu1 %v733_v7  ;;  %v738_v11 = vld [vmem:[#allocation7 + $0x10] ss:$8 sps:$4 sm:$0xff]   ;;  %v739_v12 = vld [vmem:[#allocation7 + $0x24] ss:$8 sps:$4 sm:$0xff]   ;;  %v741_v14 = vld [vmem:[#allocation7 + $0x20] ss:$8 sps:$4 sm:$0xff]  }
  0x4f   :  { %394 = vmatpush1.bf16.msra.mxu1 %v735_v8  ;;  %v732_v13 = vld [vmem:[#allocation5 + $0x30] ss:$8 sps:$4 sm:$0xff]   ;;  %v742_v15 = vld [vmem:[#allocation7 + $0x34] ss:$8 sps:$4 sm:$0xff]   ;;  %v745_v18 = vld [vmem:[#allocation7 + $0x44] ss:$8 sps:$4 sm:$0xff]  }
  0x50   :  { %149 = vmatpush1.bf16.msra.mxu0 %v726_v4  ;;  %395 = vmatprep.subr.bf16.mxu1 %v736_v9  ;;  %v81_v16 = vld [vmem:[#allocation2] sm:$0xf]  ;;  %v744_v17 = vld [vmem:[#allocation7 + $0x30] ss:$8 sps:$4 sm:$0xff]   ;;  %v747_v19 = vld [vmem:[#allocation7 + $0x40] ss:$8 sps:$4 sm:$0xff]  }
  0x51   :  { %150 = vmatprep.subr.bf16.mxu0 %v727_v5  ;;  %v748_v20 = vld [vmem:[#allocation7 + $0x54] ss:$8 sps:$4 sm:$0xff]   ;;  %v750_v21 = vld [vmem:[#allocation7 + $0x50] ss:$8 sps:$4 sm:$0xff]   ;;  %v751_v22 = vld [vmem:[#allocation7 + $0x64] ss:$8 sps:$4 sm:$0xff]  }
  0x52   :  { %v753_v23 = vld [vmem:[#allocation7 + $0x60] ss:$8 sps:$4 sm:$0xff]   ;;  %v754_v24 = vld [vmem:[#allocation7 + $0x74] ss:$8 sps:$4 sm:$0xff]   ;;  %v756_v25 = vld [vmem:[#allocation7 + $0x70] ss:$8 sps:$4 sm:$0xff]  }
  0x53   :  { %396 = vmatpush1.bf16.msra.mxu1 %v738_v11  ;;  %v757_v26 = vld [vmem:[#allocation7 + $0x84] ss:$8 sps:$4 sm:$0xff]   ;;  %v759_v27 = vld [vmem:[#allocation7 + $0x80] ss:$8 sps:$4 sm:$0xff]   ;;  %v760_v28 = vld [vmem:[#allocation7 + $0x94] ss:$8 sps:$4 sm:$0xff]  }
  0x54   :  { %151 = vmatpush1.bf16.msra.mxu0 %v729_v6  ;;  %397 = vmatprep.subr.bf16.mxu1 %v739_v12  ;;  %v762_v29 = vld [vmem:[#allocation7 + $0x90] ss:$8 sps:$4 sm:$0xff]   ;;  %v763_v30 = vld [vmem:[#allocation7 + $0xa4] ss:$8 sps:$4 sm:$0xff]   ;;  %v765_v31 = vld [vmem:[#allocation7 + $0xa0] ss:$8 sps:$4 sm:$0xff]  }
  0x55   :  { %152 = vmatprep.subr.bf16.mxu0 %v730_v10  ;;  %v766_v32 = vld [vmem:[#allocation7 + $0xb4] ss:$8 sps:$4 sm:$0xff]   ;;  %v768_v33 = vld [vmem:[#allocation7 + $0xb0] ss:$8 sps:$4 sm:$0xff]   ;;  %v769_v34 = vld [vmem:[#allocation7 + $0xc4] ss:$8 sps:$4 sm:$0xff]  }
  0x56   :  { %v771_v35 = vld [vmem:[#allocation7 + $0xc0] ss:$8 sps:$4 sm:$0xff]   ;;  %v772_v36 = vld [vmem:[#allocation7 + $0xd4] ss:$8 sps:$4 sm:$0xff]   ;;  %v774_v37 = vld [vmem:[#allocation7 + $0xd0] ss:$8 sps:$4 sm:$0xff]  }
  0x57   :  { %398 = vmatpush1.bf16.msra.mxu1 %v741_v14  ;;  %v775_v38 = vld [vmem:[#allocation7 + $0xe4] ss:$8 sps:$4 sm:$0xff]   ;;  %v777_v39 = vld [vmem:[#allocation7 + $0xe0] ss:$8 sps:$4 sm:$0xff]   ;;  %v778_v40 = vld [vmem:[#allocation7 + $0xf4] ss:$8 sps:$4 sm:$0xff]  }
  0x58   :  { %153 = vmatpush1.bf16.msra.mxu0 %v732_v13  ;;  %399 = vmatprep.subr.bf16.mxu1 %v742_v15  ;;  %v780_v41 = vld [vmem:[#allocation7 + $0xf0] ss:$8 sps:$4 sm:$0xff]   ;;  %v781_v42 = vld [vmem:[#allocation8 + $0x40] sm:$0xff]   ;;  %v783_v44 = vld [vmem:[#allocation8 + $0x48] sm:$0xff]   ;;  %v93_v55 = vshrl.u32 %v92_v54, 7 }
  0x59   :  { %v782_v43 = vld [vmem:[#allocation8] sm:$0xff]   ;;  %689 = vmatprep.subr.bf16.mxu0 %v781_v42  ;;  %v784_v45 = vld [vmem:[#allocation8 + $0x8] sm:$0xff]   ;;  %v785_v46 = vld [vmem:[#allocation8 + $0x50] sm:$0xff]  }
  0x5a   :  { %v786_v47 = vld [vmem:[#allocation8 + $0x10] sm:$0xff]   ;;  %v787_v48 = vld [vmem:[#allocation8 + $0x58] sm:$0xff]   ;;  %v789_v50 = vld [vmem:[#allocation8 + $0x60] sm:$0xff]   ;;  %v94_v56 = vsub.s32 0, %v93_v55  ;;  %v98_v58 = vsub.s32 1, %v93_v55 }
  0x5b   :  { %639 = vmatmul.mubr.msk.bf16.vlgmr.msra.gmra.mrb[0].mxu0 %vm142_vm0, %v81_v16  ;;  %400 = vmatpush1.bf16.msra.mxu1 %v744_v17  ;;  %v788_v49 = vld [vmem:[#allocation8 + $0x18] sm:$0xff]   ;;  %v790_v51 = vld [vmem:[#allocation8 + $0x20] sm:$0xff]   ;;  %v791_v52 = vld [vmem:[#allocation8 + $0x68] sm:$0xff]  }
  0x5c   :  { %401 = vmatprep.subr.bf16.mxu1 %v745_v18  ;;  %690 = vmatpush3.bf16.msra.mxu0 %v782_v43  ;;  %v792_v53 = vld [vmem:[#allocation8 + $0x28] sm:$0xff]   ;;  %v90_v57 = vld [vmem:[%s1042_s2] sm:$0x3]  ;;  %v793_v5 = vld [vmem:[#allocation8 + $0x70] sm:$0xff]  }
  0x5d   :  { %691 = vmatprep.subr.bf16.mxu0 %v783_v44  ;;  %v95_v59 = vrot.slane %v90_v57, %v94_v56  ;;  %v99_v60 = vrot.slane %v90_v57, %v98_v58  ;;  %v794_v6 = vld [vmem:[#allocation8 + $0x30] sm:$0xff]   ;;  %v795_v7 = vld [vmem:[#allocation8 + $0x78] sm:$0xff]  }
  0x5e   :  { %v796_v8 = vld [vmem:[#allocation8 + $0x38] sm:$0xff]  }
  0x5f   :  { %402 = vmatpush1.bf16.msra.mxu1 %v747_v19  ;;  %v221_v9 = vld [vmem:[%s1044_s4] sm:$0x3]  ;;  %s924_s4 = smov [#allocation10]  }
  0x60   :  { %403 = vmatprep.subr.bf16.mxu1 %v748_v20  ;;  %692 = vmatpush3.bf16.msra.mxu0 %v784_v45  ;;  %v226_v10 = vrot.slane %v221_v9, %v94_v56  ;;  %v230_v11 = vrot.slane %v221_v9, %v98_v58  ;;  %s620_s30 = sshll.u32 %s924_s4, 4  ;;  %s621_s30 = int_to_ptr.vmem [resolvable:$true] %s620_s30 }
  0x61   :  { %693 = vmatprep.subr.bf16.mxu0 %v785_v46  ;;  %s885_s8 = scalar_lea.vmem %s621_s30, 128  ;;  %p890_p5 = scmp.lt.s32.totalorder %s621_s30, %s621_s30 }
  0x62   :  { %p886_p4 = scmp.ne.s32.totalorder %s621_s30, %s885_s8  ;;  %p891_p6 = scmp.lt.s32.totalorder %s885_s8, %s885_s8 }
  0x63   :  { %404 = vmatpush1.bf16.msra.mxu1 %v750_v21 }
  0x64   :  { %405 = vmatprep.subr.bf16.mxu1 %v751_v22  ;;  %694 = vmatpush3.bf16.msra.mxu0 %v786_v47  ;;  %p892_p7 = por %p891_p6, %p890_p5 }
  0x65   :  { %695 = vmatprep.subr.bf16.mxu0 %v787_v48 }
  0x66   :  { %p893_p8 = pnand %p892_p7, %p886_p4 }
  0x67   :  { %406 = vmatpush1.bf16.msra.mxu1 %v753_v23  ;;  %v672_v23 = vld [vmem:[%s1046_s6] ss:$0 sm:$0xff] }
  0x68   :  { %407 = vmatprep.subr.bf16.mxu1 %v754_v24  ;;  %696 = vmatpush3.bf16.msra.mxu0 %v788_v49 }
  0x69   :  { %697 = vmatprep.subr.bf16.mxu0 %v789_v50 }
  0x6b   :  { %408 = vmatpush1.bf16.msra.mxu1 %v756_v25 }
  0x6c   :  { %409 = vmatprep.subr.bf16.mxu1 %v757_v26  ;;  %698 = vmatpush3.bf16.msra.mxu0 %v790_v51 }
  0x6d   :  { %699 = vmatprep.subr.bf16.mxu0 %v791_v52 }
  0x6f   :  { %410 = vmatpush1.bf16.msra.mxu1 %v759_v27 }
  0x70   :  { %411 = vmatprep.subr.bf16.mxu1 %v760_v28  ;;  %700 = vmatpush3.bf16.msra.mxu0 %v792_v53 }
  0x71   :  { %701 = vmatprep.subr.bf16.mxu0 %v793_v5 }
  0x73   :  { %412 = vmatpush1.bf16.msra.mxu1 %v762_v29 }
  0x74   :  { %413 = vmatprep.subr.bf16.mxu1 %v763_v30  ;;  %702 = vmatpush3.bf16.msra.mxu0 %v794_v6 }
  0x75   :  { %703 = vmatprep.subr.bf16.mxu0 %v795_v7 }
  0x77   :  { %414 = vmatpush1.bf16.msra.mxu1 %v765_v31 }
  0x78   :  { %415 = vmatprep.subr.bf16.mxu1 %v766_v32  ;;  %704 = vmatpush3.bf16.msra.mxu0 %v796_v8 }
  0x7b   :  { %416 = vmatpush1.bf16.msra.mxu1 %v768_v33 }
  0x7c   :  { %417 = vmatprep.subr.bf16.mxu1 %v769_v34 }
  0x7f   :  { %418 = vmatpush1.bf16.msra.mxu1 %v771_v35 }
  0x80   :  { %419 = vmatprep.subr.bf16.mxu1 %v772_v36 }
  0x83   :  { %420 = vmatpush1.bf16.msra.mxu1 %v774_v37 }
  0x84   :  { %421 = vmatprep.subr.bf16.mxu1 %v775_v38 }
  0x87   :  { %422 = vmatpush1.bf16.msra.mxu1 %v777_v39 }
  0x88   :  { %423 = vmatprep.subr.bf16.mxu1 %v778_v40 }
  0x8b   :  { %424 = vmatpush1.bf16.msra.mxu1 %v780_v41 }
 0x12e   :  { %v180_v61 = vpop.f32.mrb[0].mxu0 }
 0x12f   :  { %v181_v62 = vadd.f32 %v180_v61, %v95_v59  ;;  %v182_v63 = vpop.f32.mrb[1].mxu0 }
 0x130   :  { %v184_v0 = vpop.f32.mrb[2].mxu0  ;;  %v183_v1 = vadd.f32 %v182_v63, %v99_v60 }
 0x131   :  { %v185_v2 = vpop.f32.mrb[3].mxu0  ;;  %v187_v4 = vpack.c.bf16 %v181_v62, %v181_v62 }
 0x132   :  { %v188_v3 = vpack.c.bf16 %v183_v1, %v183_v1 }
 0x134   :  { %425 = vmatprep.mubr.bf16.mxu1 %v188_v3 }
 0x135   :  { %426 = vmatmul.mubr.bf16.vlgmr.msra.gmra.mrb[0].mxu1 %v187_v4 }
 0x208   :  { %v427_v12 = vpop.f32.mrb[0].mxu1 }
 0x209   :  { %v428_v13 = vadd.f32 %v427_v12, %v226_v10  ;;  %v429_v14 = vpop.f32.mrb[1].mxu1 }
 0x20a   :  { %v430_v15 = vadd.f32 %v429_v14, %v230_v11  ;;  %v431_v16 = vpop.f32.mrb[2].mxu1 }
 0x20b   :  { %v434_v17 = vmax.f32 %v428_v13, 0.0  ;;  %v432_v18 = vpop.f32.mrb[3].mxu1 }
 0x20c   :  { %v435_v19 = vmax.f32 %v430_v15, 0.0 }
 0x20d   :  { %v436_v21 = vpack.c.bf16 %v434_v17, %v434_v17 }
 0x20e   :  { %v437_v20 = vpack.c.bf16 %v435_v19, %v435_v19 }
 0x210   :  { %605 = vmatprep.mubr.bf16.mxu0 %v437_v20 }
 0x211   :  { %606 = vmatmul.mubr.bf16.vlgmr.msra.gmra.mrb[4].mxu0 %v436_v21 }
 0x2e4   :  { %v705_v22 = vpop.f32.mrb[4].mxu0 }
 0x2e5   :  { %v706_v24 = vpop.f32.mrb[5].mxu0 }
 0x2e6   :  { %v707_v25 = vadd.f32 %v706_v24, %v705_v22  ;;  %v708_v26 = vpop.f32.mrb[6].mxu0 }
 0x2e7   :  { %v709_v27 = vpop.f32.mrb[7].mxu0 }
 0x2e8   :  { %v608_v28 = vadd.f32 %v707_v25, %v672_v23 }
 0x2ea   :  { %613 = vst [vmem:[#allocation10] sm:$0xff] %v608_v28 }
 0x2eb   :  { %896 = shalt.err (!%p893_p8)
}
 0x2ec   :  { %s897_s6 = scalar_lea.hbm %s1047_s7, 128 }
 0x2ed   :  { %p898_p9 = scmp.ne.s32.totalorder %s1047_s7, %s897_s6  ;;  %p901_p10 = scmp.lt.u32.totalorder %s897_s6, %s1047_s7 }
 0x2ef   :  { %p903_p11 = pnand %p901_p10, %p898_p9 }
 0x2f1   :  { %906 = shalt.err (!%p903_p11)
}
 0x2f2   :  { %623 = dma.vmem_to_hbm [thread:$0]  %s621_s30, 128, %s1047_s7, [#allocation4]  }
 0x2f3   :  { %913 = dma.done.wait [#allocation4], 128  }
 0x2f4   :  { %914 = vsyncadd [#allocation4], 4294967168 }
 0x2f5   :  { %627 = vsyncpa [#allocation3], 1 }
 0x2f6   :  { %628 = vsyncpa [#allocation6], 1 }
 0x2f7   :  { %629 = vsyncpa [#allocation9], 1 }
 0x2f8   :  { %630 = vsyncpa [#allocation4], 1 }

</bundles_post_ra>
